<compile_context>
chip_gen: v7x
topology: tpu7x:2x2x1
jax: 0.10.0
libtpu: 0.0.40
codegen_flags: <defaults>
</compile_context>

<pallas_src>
import functools
import math

import jax
import jax.numpy as jnp
from jax.experimental import pallas as pl
from jax.experimental.pallas import tpu as pltpu

_LOG_SQRT_2PI = 0.5 * math.log(2.0 * math.pi)
# Contract the last dim of both operands: out = lhs @ rhs.T  (rhs fed natural).
_CONTRACT_LAST = (((1,), (1,)), ((), ()))
# Lane-dim tile cap; double-buffered blocks at this size are ~3 MiB of VMEM.
_TB_MAX = 8192


def _policy_kernel(x_ref, epst_ref, w1t_ref, b1_ref, wht_ref, bh_ref, out_ref, *,
                   action_dim, action_bound):
    A = action_dim

    # fc1 + ReLU, computed transposed (batch on the lane axis):
    #   h = W1^T @ x^T + b1.  The x-block transpose is folded into the matmul
    # (trans_b contraction), so the wrapper never materializes x^T in HBM.
    h = jax.lax.dot_general(w1t_ref[...], x_ref[...], _CONTRACT_LAST,
                            preferred_element_type=jnp.float32) + b1_ref[...]
    h = jnp.maximum(h, 0.0)                               # (H, TB)

    # Fused mu/std head: one (2A, H) @ (H, TB) matmul instead of two N=A dots.
    head = jnp.dot(wht_ref[...], h,
                   preferred_element_type=jnp.float32) + bh_ref[...]
    mu = head[0:A, :]                                     # (A, TB)
    std = jnp.logaddexp(head[A:, :], 0.0)                 # softplus, (A, TB)

    eps = epst_ref[...]                                   # (A, TB)

    # Normal(mu, std).rsample() == mu + std * eps, and its log-prob:
    #   log N(sample; mu, std) = -0.5*((sample-mu)/std)^2 - log(std) - log(sqrt(2pi))
    #                          = -0.5*eps^2 - log(std) - log(sqrt(2pi))   (exact)
    sample = mu + std * eps
    action = jnp.tanh(sample)
    # NOTE: the double tanh is intentional — faithful to the PyTorch source,
    # which uses tanh(action) (not tanh(sample)) inside the Jacobian term.
    t2 = jnp.tanh(action)
    # Fused single log: -log(std) - log(1 - t2^2 + 1e-7) == -log(std*(1-t2^2+1e-7)).
    log_prob = (-0.5 * eps * eps - _LOG_SQRT_2PI
                - jnp.log(std * (1.0 - t2 * t2 + 1e-07)))

    # Lane-dense packed store: rows [0:A) action, rows [A:2A) log_prob.
    # Two direct slice stores — no temporary concatenate.
    # (If action_dim changes, keep 2A a multiple of 8 for clean sublane tiles.)
    out_ref[0:A, :] = action * action_bound
    out_ref[A:, :] = log_prob


def _batch_tiling(batch):
    """Return (tile, padded_batch, steps).

    One full-batch block whenever it fits (no padding, no per-step overhead);
    otherwise balanced 128-aligned tiles with an even step count so v7x's two
    TensorCores each get a large, equal share.
    """
    if batch <= _TB_MAX:
        return batch, batch, 1
    steps = -(-batch // _TB_MAX)          # cdiv
    if steps % 2:
        steps += 1                        # even split for megacore balance
    per = -(-batch // steps)
    tb = ((per + 127) // 128) * 128
    return tb, tb * steps, steps


@functools.partial(jax.jit, static_argnums=(3,))
def policy_net_continuous(x, params, eps, action_bound):
    """SAC continuous policy forward pass as a single Pallas TPU kernel."""
    w1, b1, wmu, bmu, wsd, bsd = params
    B, S = x.shape
    H = w1.shape[1]
    A = wmu.shape[1]

    # Tiny parameter repacking (KBs): transposed fc1, fused & transposed mu|std head.
    w1t = jnp.asarray(w1).T                                        # (H, S)
    b1t = jnp.asarray(b1).reshape(H, 1)                            # (H, 1)
    wht = jnp.concatenate([jnp.asarray(wmu), jnp.asarray(wsd)], axis=1).T   # (2A, H)
    bht = jnp.concatenate([jnp.asarray(bmu), jnp.asarray(bsd)], axis=1).reshape(2 * A, 1)

    # Only the small (B, A) noise tensor is transposed wrapper-side (exact).
    eps_t = jnp.asarray(eps).T                                     # (A, B)

    tb, b_pad, steps = _batch_tiling(B)
    if b_pad != B:  # only possible for batches > _TB_MAX
        x = jnp.pad(x, ((0, b_pad - B), (0, 0)))
        eps_t = jnp.pad(eps_t, ((0, 0), (0, b_pad - B)))

    kernel = functools.partial(_policy_kernel, action_dim=A,
                               action_bound=float(action_bound))

    full = lambda shape: pl.BlockSpec(shape, lambda i: (0, 0))

    flops = 2 * b_pad * H * (S + 2 * A) + 16 * b_pad * A
    transcendentals = 5 * b_pad * A          # softplus(2) + 2*tanh + fused log
    bytes_accessed = 4 * (b_pad * (S + A) + 2 * A * b_pad
                          + H * (S + 1) + 2 * A * (H + 1))

    out = pl.pallas_call(
        kernel,
        out_shape=jax.ShapeDtypeStruct((2 * A, b_pad), jnp.float32),
        grid_spec=pltpu.PrefetchScalarGridSpec(
            num_scalar_prefetch=0,
            grid=(steps,),
            in_specs=[
                pl.BlockSpec((tb, S), lambda i: (i, 0)),      # x   (natural layout)
                pl.BlockSpec((A, tb), lambda i: (0, i)),      # eps^T
                full((H, S)),                                 # W1^T
                full((H, 1)),                                 # b1
                full((2 * A, H)),                             # [Wmu | Wsd]^T
                full((2 * A, 1)),                             # [bmu | bsd]
            ],
            out_specs=pl.BlockSpec((2 * A, tb), lambda i: (0, i)),
        ),
        compiler_params=pltpu.CompilerParams(
            dimension_semantics=("parallel",)),
        cost_estimate=pl.CostEstimate(
            flops=flops, transcendentals=transcendentals,
            bytes_accessed=bytes_accessed),
    )(x, eps_t, w1t, b1t, wht, bht)

    # Single transpose of the packed lane-dense result, then column slices
    # (all fused under this jit).
    out_bt = (out[:, :B] if b_pad != B else out).T               # (B, 2A)
    action = out_bt[:, :A]
    log_prob = out_bt[:, A:]
    return action, log_prob


def init_params(key, state_dim, hidden_dim, action_dim):
    """Deterministic synthetic parameter init (Linear weights stored as (in, out))."""
    ks = jax.random.split(key, 6)
    w1 = 0.1 * jax.random.normal(ks[0], (state_dim, hidden_dim), jnp.float32)
    b1 = 0.1 * jax.random.normal(ks[1], (1, hidden_dim), jnp.float32)
    wmu = 0.1 * jax.random.normal(ks[2], (hidden_dim, action_dim), jnp.float32)
    bmu = 0.1 * jax.random.normal(ks[3], (1, action_dim), jnp.float32)
    wsd = 0.1 * jax.random.normal(ks[4], (hidden_dim, action_dim), jnp.float32)
    bsd = 0.1 * jax.random.normal(ks[5], (1, action_dim), jnp.float32)
    return (w1, b1, wmu, bmu, wsd, bsd)


if __name__ == "__main__":
    state_dim, hidden_dim, action_dim = 16, 32, 4
    action_bound = 2.0
    batch = 8

    key = jax.random.PRNGKey(0)
    k_params, k_x, k_eps = jax.random.split(key, 3)

    params = init_params(k_params, state_dim, hidden_dim, action_dim)
    x = jax.random.normal(k_x, (batch, state_dim), jnp.float32)
    # Reparameterization noise for Normal(mu, std).rsample()
    eps = jax.random.normal(k_eps, (batch, action_dim), jnp.float32)

    action, log_prob = policy_net_continuous(x, params, eps, action_bound)
    jax.block_until_ready((action, log_prob))

    # Sanity check against a pure-JAX reference (original PyTorch formulation).
    w1, b1, wmu, bmu, wsd, bsd = params
    h = jnp.maximum(x @ w1 + b1, 0.0)
    mu = h @ wmu + bmu
    std = jax.nn.softplus(h @ wsd + bsd)
    sample = mu + std * eps
    lp = (-((sample - mu) ** 2) / (2.0 * std ** 2) - jnp.log(std)
          - 0.5 * math.log(2.0 * math.pi))
    act = jnp.tanh(sample)
    lp = lp - jnp.log(1.0 - jnp.tanh(act) ** 2 + 1e-07)
    act = act * action_bound

    assert action.shape == (batch, action_dim)
    assert log_prob.shape == (batch, action_dim)
    assert jnp.allclose(action, act, atol=1e-4, rtol=1e-4)
    assert jnp.allclose(log_prob, lp, atol=1e-4, rtol=1e-4)

    print("KERNEL_OK")
</pallas_src>

<mosaic_0001>
module attributes {stable_mosaic.version = 11 : i64} {
  func.func @_policy_kernel(%arg0: i32, %arg1: memref<8x16xf32, #tpu.memory_space<vmem>>, %arg2: memref<4x8xf32, #tpu.memory_space<vmem>>, %arg3: memref<32x16xf32, #tpu.memory_space<vmem>>, %arg4: memref<32x1xf32, #tpu.memory_space<vmem>>, %arg5: memref<8x32xf32, #tpu.memory_space<vmem>>, %arg6: memref<8x1xf32, #tpu.memory_space<vmem>>, %arg7: memref<8x8xf32, #tpu.memory_space<vmem>>) attributes {dimension_semantics = [#tpu.dimension_semantics<parallel>], iteration_bounds = array<i64: 1>, scalar_prefetch = 0 : i64, scratch_operands = 0 : i64, tpu.core_type = #tpu.core_type<tc>, window_params = [{transform_indices = @transform_0, window_bounds = array<i64: 8, 16>}, {transform_indices = @transform_1, window_bounds = array<i64: 4, 8>}, {pipeline_mode = #tpu.pipeline_mode<synchronous>, transform_indices = @transform_2, window_bounds = array<i64: 32, 16>}, {pipeline_mode = #tpu.pipeline_mode<synchronous>, transform_indices = @transform_3, window_bounds = array<i64: 32, 1>}, {pipeline_mode = #tpu.pipeline_mode<synchronous>, transform_indices = @transform_4, window_bounds = array<i64: 8, 32>}, {pipeline_mode = #tpu.pipeline_mode<synchronous>, transform_indices = @transform_5, window_bounds = array<i64: 8, 1>}, {transform_indices = @transform_6, window_bounds = array<i64: 8, 8>}]} {
    %c0 = arith.constant 0 : index
    %c0_0 = arith.constant 0 : index
    %0 = vector.load %arg3[%c0, %c0_0] : memref<32x16xf32, #tpu.memory_space<vmem>>, vector<32x16xf32>
    %c0_1 = arith.constant 0 : index
    %c0_2 = arith.constant 0 : index
    %1 = vector.load %arg1[%c0_1, %c0_2] : memref<8x16xf32, #tpu.memory_space<vmem>>, vector<8x16xf32>
    %cst = arith.constant dense<0.000000e+00> : vector<32x8xf32>
    %2 = tpu.matmul %0, %1, %cst {dimension_numbers = #tpu.dot_dimension_numbers<[1], [1], [0], [0], [0, 0, 1, 0], [], []>} : vector<32x16xf32>, vector<8x16xf32>, vector<32x8xf32> -> vector<32x8xf32>
    %c0_3 = arith.constant 0 : index
    %c0_4 = arith.constant 0 : index
    %3 = vector.load %arg4[%c0_3, %c0_4] : memref<32x1xf32, #tpu.memory_space<vmem>>, vector<32x1xf32>
    %4 = vector.broadcast %3 : vector<32x1xf32> to vector<32x8xf32>
    %5 = arith.addf %2, %4 : vector<32x8xf32>
    %cst_5 = arith.constant 0.000000e+00 : f32
    %6 = vector.broadcast %cst_5 : f32 to vector<32x8xf32>
    %7 = arith.maximumf %5, %6 : vector<32x8xf32>
    %c0_6 = arith.constant 0 : index
    %c0_7 = arith.constant 0 : index
    %8 = vector.load %arg5[%c0_6, %c0_7] : memref<8x32xf32, #tpu.memory_space<vmem>>, vector<8x32xf32>
    %cst_8 = arith.constant dense<0.000000e+00> : vector<8x8xf32>
    %9 = tpu.matmul %8, %7, %cst_8 {dimension_numbers = #tpu.dot_dimension_numbers<[1], [0], [0], [1], [0, 0, 1, 1], [], []>} : vector<8x32xf32>, vector<32x8xf32>, vector<8x8xf32> -> vector<8x8xf32>
    %c0_9 = arith.constant 0 : index
    %c0_10 = arith.constant 0 : index
    %10 = vector.load %arg6[%c0_9, %c0_10] : memref<8x1xf32, #tpu.memory_space<vmem>>, vector<8x1xf32>
    %11 = vector.broadcast %10 : vector<8x1xf32> to vector<8x8xf32>
    %12 = arith.addf %9, %11 : vector<8x8xf32>
    %13 = vector.extract_strided_slice %12 {offsets = [0, 0], sizes = [4, 8], strides = [1, 1]} : vector<8x8xf32> to vector<4x8xf32>
    %14 = vector.extract_strided_slice %12 {offsets = [4, 0], sizes = [4, 8], strides = [1, 1]} : vector<8x8xf32> to vector<4x8xf32>
    %cst_11 = arith.constant 0.000000e+00 : f32
    %15 = vector.broadcast %cst_11 : f32 to vector<4x8xf32>
    %16 = arith.maximumf %14, %15 : vector<4x8xf32>
    %17 = vector.broadcast %cst_11 : f32 to vector<4x8xf32>
    %18 = arith.subf %14, %17 : vector<4x8xf32>
    %19 = arith.cmpf one, %18, %18 : vector<4x8xf32>
    %20 = vector.broadcast %cst_11 : f32 to vector<4x8xf32>
    %21 = arith.addf %14, %20 : vector<4x8xf32>
    %22 = math.absf %18 : vector<4x8xf32>
    %cst_12 = arith.constant 0.000000e+00 : f32
    %23 = vector.broadcast %cst_12 : f32 to vector<4x8xf32>
    %24 = arith.subf %23, %22 : vector<4x8xf32>
    %25 = math.exp %24 : vector<4x8xf32>
    %26 = math.log1p %25 : vector<4x8xf32>
    %27 = arith.addf %16, %26 : vector<4x8xf32>
    %28 = arith.select %19, %21, %27 : vector<4x8xi1>, vector<4x8xf32>
    %c0_13 = arith.constant 0 : index
    %c0_14 = arith.constant 0 : index
    %29 = vector.load %arg2[%c0_13, %c0_14] : memref<4x8xf32, #tpu.memory_space<vmem>>, vector<4x8xf32>
    %30 = arith.mulf %28, %29 : vector<4x8xf32>
    %31 = arith.addf %13, %30 : vector<4x8xf32>
    %32 = math.tanh %31 : vector<4x8xf32>
    %33 = math.tanh %32 : vector<4x8xf32>
    %cst_15 = arith.constant -5.000000e-01 : f32
    %34 = vector.broadcast %cst_15 : f32 to vector<4x8xf32>
    %35 = arith.mulf %34, %29 : vector<4x8xf32>
    %36 = arith.mulf %35, %29 : vector<4x8xf32>
    %cst_16 = arith.constant 0.918938517 : f32
    %37 = vector.broadcast %cst_16 : f32 to vector<4x8xf32>
    %38 = arith.subf %36, %37 : vector<4x8xf32>
    %39 = arith.mulf %33, %33 : vector<4x8xf32>
    %cst_17 = arith.constant 1.000000e+00 : f32
    %40 = vector.broadcast %cst_17 : f32 to vector<4x8xf32>
    %41 = arith.subf %40, %39 : vector<4x8xf32>
    %cst_18 = arith.constant 1.000000e-07 : f32
    %42 = vector.broadcast %cst_18 : f32 to vector<4x8xf32>
    %43 = arith.addf %41, %42 : vector<4x8xf32>
    %44 = arith.mulf %28, %43 : vector<4x8xf32>
    %45 = math.log %44 : vector<4x8xf32>
    %46 = arith.subf %38, %45 : vector<4x8xf32>
    %cst_19 = arith.constant 2.000000e+00 : f32
    %47 = vector.broadcast %cst_19 : f32 to vector<4x8xf32>
    %48 = arith.mulf %32, %47 : vector<4x8xf32>
    %c0_20 = arith.constant 0 : index
    %c0_21 = arith.constant 0 : index
    %49 = vector.load %arg7[%c0_20, %c0_21] : memref<8x8xf32, #tpu.memory_space<vmem>>, vector<4x8xf32>
    tpu.vector_store %arg7[%c0_20, %c0_21], %48 {strides = array<i32>} : memref<8x8xf32, #tpu.memory_space<vmem>>, vector<4x8xf32>,
    %c4 = arith.constant 4 : index
    %c0_22 = arith.constant 0 : index
    %50 = vector.load %arg7[%c4, %c0_22] : memref<8x8xf32, #tpu.memory_space<vmem>>, vector<4x8xf32>
    tpu.vector_store %arg7[%c4, %c0_22], %46 {strides = array<i32>} : memref<8x8xf32, #tpu.memory_space<vmem>>, vector<4x8xf32>,
    return
  }
  func.func @transform_0(%arg0: i32) -> (i32, i32) {
    %c0_i32 = arith.constant 0 : i32
    %c0_i32_0 = arith.constant 0 : i32
    return %arg0, %c0_i32 : i32, i32
  }
  func.func @transform_1(%arg0: i32) -> (i32, i32) {
    %c0_i32 = arith.constant 0 : i32
    %c0_i32_0 = arith.constant 0 : i32
    return %c0_i32, %arg0 : i32, i32
  }
  func.func @transform_2(%arg0: i32) -> (i32, i32) {
    %c0_i32 = arith.constant 0 : i32
    %c0_i32_0 = arith.constant 0 : i32
    %c0_i32_1 = arith.constant 0 : i32
    return %c0_i32, %c0_i32_0 : i32, i32
  }
  func.func @transform_3(%arg0: i32) -> (i32, i32) {
    %c0_i32 = arith.constant 0 : i32
    %c0_i32_0 = arith.constant 0 : i32
    %c0_i32_1 = arith.constant 0 : i32
    return %c0_i32, %c0_i32_0 : i32, i32
  }
  func.func @transform_4(%arg0: i32) -> (i32, i32) {
    %c0_i32 = arith.constant 0 : i32
    %c0_i32_0 = arith.constant 0 : i32
    %c0_i32_1 = arith.constant 0 : i32
    return %c0_i32, %c0_i32_0 : i32, i32
  }
  func.func @transform_5(%arg0: i32) -> (i32, i32) {
    %c0_i32 = arith.constant 0 : i32
    %c0_i32_0 = arith.constant 0 : i32
    %c0_i32_1 = arith.constant 0 : i32
    return %c0_i32, %c0_i32_0 : i32, i32
  }
  func.func @transform_6(%arg0: i32) -> (i32, i32) {
    %c0_i32 = arith.constant 0 : i32
    %c0_i32_0 = arith.constant 0 : i32
    return %c0_i32, %arg0 : i32, i32
  }
}

</mosaic_0001>

<bundles_post_ra>
// kernel: policy_net_continuous.1
= control target key start
LH: loop header
LB: loop body
LE: loop exit
PB: predicated region body
PF: predicated region fallthrough
CT: control target
= control target key end

     0   :  { %vm52_vm0 = vcmask 130048   ;;  %v349_v2 = vmov 0   ;;  %v350_v11 = vmov 0.0|0.0   ;;  %vm351_vm1 = vmmov 0   ;;  %s438_s0 = inlined_call_operand.vmem [shape: f32[8,16], index: 0, kind: input, shape index: {}]   ;;  %s439_s2 = inlined_call_operand.vmem [shape: f32[32,16], index: 2, kind: input, shape index: {}]   ;;  %s440_s3 = inlined_call_operand.vmem [shape: f32[32,1], index: 3, kind: input, shape index: {}]   ;;  %s441_s5 = inlined_call_operand.vmem [shape: f32[8,1], index: 5, kind: input, shape index: {}]   ;;  %s442_s4 = inlined_call_operand.vmem [shape: f32[8,32], index: 4, kind: input, shape index: {}]   ;;  %s443_s1 = inlined_call_operand.vmem [shape: f32[4,8], index: 1, kind: input, shape index: {}]   ;;  %s444_s6 = inlined_call_operand.vmem [shape: f32[8,8], index: 6, kind: output, shape index: {}]  }
   0x1   :  { %v27_v0 = vld [vmem:[%s438_s0] sm:$0xff]  ;;  %337 = vset.pattern.permute.xlu0 %v349_v2  ;;  %338 = vset.pattern.permute.xlu1 %v349_v2  ;;  %v24_v4 = vld [vmem:[%s439_s2 + $0x8] sm:$0xff]  ;;  %v30_v5 = vld [vmem:[%s440_s3 + $0x10] sm:$0xff]  ;;  %v352_v12 = vmov 0.0   ;;  %vm164_vm2 = vcmask 261120   ;;  %vm284_vm5 = vcmask 60416  }
   0x2   :  { %v23_v1 = vld [vmem:[%s439_s2] sm:$0xff]  ;;  %308 = vmatprep.subr.msk.mxu0 %vm52_vm0, %v27_v0  ;;  %v25_v6 = vld [vmem:[%s439_s2 + $0x10] sm:$0xff]  ;;  %v29_v7 = vld [vmem:[%s440_s3 + $0x8] sm:$0xff]  ;;  %44 = vperm.xlu1 %338, %v30_v5  }
   0x3   :  { %310 = vmatprep.mubr.msk.f32.mxu0 %vm52_vm0, %v23_v1  ;;  %v28_v3 = vld [vmem:[%s440_s3] sm:$0xff]  ;;  %309 = vmatpush3.xpose.msk.msra.mxu0 %vm52_vm0, %v27_v0  ;;  %v31_v8 = vld [vmem:[%s440_s3 + $0x18] sm:$0xff] }
   0x4   :  { %34 = vperm.xlu0 %337, %v28_v3   ;;  %v26_v9 = vld [vmem:[%s439_s2 + $0x18] sm:$0xff]  ;;  %v158_v10 = vld [vmem:[%s441_s5] sm:$0xff]  ;;  %327 = vmatprep.subr.bf16.mxu1 %v350_v11 }
   0x5   :  { %324 = vmatprep.mubr.msk.f32.mxu1 %vm351_vm1, %v352_v12  ;;  %v157_v31 = vld [vmem:[%s442_s4] sm:$0xff] }
   0x6   :  { %311 = vmatmul.mubr.msk.f32.vlgmr.msra.gmra.mrb[0].mxu0 %vm52_vm0, %v24_v4  ;;  %49 = vperm.xlu1 %338, %v31_v8   ;;  %v256_v45 = vld [vmem:[%s443_s1] sm:$0xf] }
   0x7   :  { %313 = vmatprep.mubr.msk.f32.mxu0 %vm52_vm0, %v25_v6  ;;  %v258_v50 = vrot.slane %v256_v45, 4  ;;  %v267_v0 = vmul.f32 -0.5, %v256_v45 }
   0x8   :  { %39 = vperm.xlu0 %337, %v29_v7  }
   0x9   :  { %v268_v1 = vmul.f32 %v267_v0, %v256_v45 }
   0xa   :  { %314 = vmatmul.mubr.msk.f32.gmra.mrb[2].mxu0 %vm52_vm0, %v26_v9 }
   0xb   :  { %v297_v3 = vadd.f32 -0.9189385, %v268_v1 }
   0xc   :  { %161 = vperm.xlu0 %337, %v158_v10  }
  0x81   :  { %v45_v14 = vpop.permute.xlu1 %44 }
  0x83   :  { %v35_v13 = vpop.permute.xlu0 %34 }
  0x85   :  { %v50_v21 = vpop.permute.xlu1 %49 }
  0x87   :  { %v40_v15 = vpop.permute.xlu0 %39 }
  0x8b   :  { %v162_v32 = vpop.permute.xlu0 %161 }
  0xd9   :  { %v312_v16 = vpop.f32.mrb[0].mxu0 }
  0xda   :  { %v140_v17 = vadd.f32 %v312_v16, %v40_v15  ;;  %v134_v18 = vpop.f32.mrb[1].mxu0 }
  0xdb   :  { %v135_v19 = vadd.f32 %v134_v18, %v35_v13 }
  0xdc   :  { %v154_v20 = vmax.f32 %v140_v17, 0.0 }
  0xdd   :  { %v153_v22 = vmax.f32 %v135_v19, 0.0  ;;  %v315_v23 = vpop.f32.mrb[2].mxu0 }
  0xde   :  { %v150_v24 = vadd.f32 %v315_v23, %v50_v21  ;;  %v144_v25 = vpop.f32.mrb[3].mxu0 }
  0xdf   :  { %v145_v26 = vadd.f32 %v144_v25, %v45_v14  ;;  %v328_v27 = vpack.c.bf16 %v154_v20, %v153_v22 }
  0xe0   :  { %v156_v28 = vmax.f32 %v150_v24, 0.0 }
  0xe1   :  { %v155_v29 = vmax.f32 %v145_v26, 0.0  ;;  %329 = vmatpush3.bf16.msra.mxu1 %v328_v27 }
  0xe2   :  { %330 = vmatprep.subr.bf16.mxu1 %v350_v11 }
  0xe3   :  { %v331_v30 = vpack.c.bf16 %v156_v28, %v155_v29 }
  0xe5   :  { %332 = vmatpush3.bf16.msra.mxu1 %v331_v30 }
  0xe8   :  { %325 = vmatmul.mubr.msk.f32.vlgmr.msra.gmra.mrb[0].mxu1 %vm164_vm2, %v157_v31 }
 0x1bb   :  { %v234_v33 = vpop.f32.mrb[0].mxu1 }
 0x1bc   :  { %v235_v34 = vadd.f32 %v234_v33, %v162_v32  ;;  %v326_v35 = vpop.f32.mrb[1].mxu1 }
 0x1be   :  { %v241_v36 = vand.u32 2147483647, %v235_v34  ;;  %v238_v48 = vmax.f32 %v235_v34, 0.0  ;;  %vm239_vm4 = vcmp.ne.f32.partialorder %v235_v34, %v235_v34 }
 0x1c0   :  { %v242_v37 = vsub.f32 0.0, %v241_v36 }
 0x1c2   :  { %v243_v38 = vmul.f32 1.442695, %v242_v37 }
 0x1c4   :  { %339 = vpow2.f32 %v243_v38 }
 0x1ce   :  { %v340_v39 = vpop.eup %339 }
 0x1cf   :  { %v245_v40 = vadd.f32 1.0, %v340_v39  ;;  %v248_v41 = vmul.f32 -0.5, %v340_v39  ;;  %v251_v43 = vand.u32 2147483647, %v340_v39 }
 0x1d1   :  { %341 = vlog2.f32 %v245_v40  ;;  %v249_v42 = vadd.f32 1.0, %v248_v41  ;;  %vm252_vm3 = vcmp.lt.f32.partialorder %v251_v43, 0.0004427343 }
 0x1d3   :  { %v250_v47 = vmul.f32 %v340_v39, %v249_v42 }
 0x1db   :  { %v342_v44 = vpop.eup %341 }
 0x1dc   :  { %v247_v46 = vmul.f32 0.6931472, %v342_v44 }
 0x1de   :  { %v253_v49 = vsel %vm252_vm3, %v250_v47, %v247_v46 }
 0x1df   :  { %v254_v51 = vadd.f32 %v253_v49, %v238_v48 }
 0x1e1   :  { %v255_v52 = vsel %vm239_vm4, %v235_v34, %v254_v51 }
 0x1e2   :  { %v260_v53 = vmul.f32 %v258_v50, %v255_v52 }
 0x1e4   :  { %v262_v54 = vrot.slane %v260_v53, 4 }
 0x1e6   :  { %v264_v55 = vadd.f32 %v262_v54, %v235_v34 }
 0x1e8   :  { %343 = vtanh.f32 %v264_v55 }
 0x1f2   :  { %v344_v56 = vpop.eup %343 }
 0x1f3   :  { %345 = vtanh.f32 %v344_v56  ;;  %v283_v57 = vmul.f32 2.0, %v344_v56 }
 0x1f5   :  { %285 = vst.msk [vmem:[%s444_s6] sm:$0xf] %vm284_vm5, %v283_v57 }
 0x1fd   :  { %v346_v58 = vpop.eup %345 }
 0x1fe   :  { %v270_v59 = vmul.f32 %v346_v58, %v346_v58 }
 0x200   :  { %v271_v60 = vsub.f32 1.0, %v270_v59 }
 0x202   :  { %v272_v61 = vadd.f32 1e-07, %v271_v60 }
 0x204   :  { %v274_v62 = vrot.slane %v272_v61, 4 }
 0x206   :  { %v276_v63 = vmul.f32 %v274_v62, %v255_v52 }
 0x208   :  { %347 = vlog2.f32 %v276_v63 }
 0x212   :  { %v348_v2 = vpop.eup %347 }
 0x213   :  { %v278_v4 = vmul.f32 0.6931472, %v348_v2 }
 0x215   :  { %v280_v5 = vrot.slane %v278_v4, 4 }
 0x217   :  { %v282_v6 = vsub.f32 %v297_v3, %v280_v5 }
 0x219   :  { %286 = vst.msk [vmem:[%s444_s6 + $0x4] sm:$0xf] %vm284_vm5, %v282_v6 }

</bundles_post_ra>
